<compile_context>
chip_gen: v7x
topology: tpu7x:2x2x1
jax: 0.10.0
libtpu: 0.0.40
codegen_flags: <defaults>
</compile_context>

<pallas_src>
import jax
import jax.numpy as jnp
import numpy as np
from jax.experimental import pallas as pl
from jax.experimental.pallas import tpu as pltpu


# ---------------------------------------------------------------------------
# Tile choosers (conservative VMEM footprint on all generations)
# ---------------------------------------------------------------------------
def _pick_hw_tile(hw, cap):
    """Largest lane tile: full HW if it fits, else the biggest divisor of HW
    that is a multiple of 128 and <= cap (block last dim must be a multiple of
    128 or equal to the full dim)."""
    if hw <= cap:
        return hw
    start = cap - (cap % 128)
    for t in range(start, 0, -128):
        if hw % t == 0:
            return t
    return hw  # no 128-multiple divisor; fall back to the full (untiled) axis


def _pick_batch_block(n, hw_tile, cap):
    """Group batches into one block while the block stays <= cap lanes wide
    (amortizes per-grid-step overhead in the tiny-image/demo regime)."""
    nb = min(n, max(1, cap // hw_tile))
    while n % nb:
        nb -= 1
    return nb


# ---------------------------------------------------------------------------
# Pallas kernel: one (NB, C, HW_TILE) block, channel-first (HW on lanes)
# ---------------------------------------------------------------------------
def _degra_kernel(x_ref, corr_ref, wc_ref, bc_ref, s_ref, out_ref):
    """out = x + ((Wc @ x + bc) * s) * corr

    Wc/bc: exact fold of SAM.conv3 ∘ SAM.conv2 (both 1x1, no activation in
    between).  s: per-image CALayer gate, precomputed in the wrapper (the
    global average pool commutes with the linear fold).  Single MXU matmul
    per batch row, f32 accumulation, no in-kernel reduction phase.
    """
    wc = wc_ref[...]                      # (C, C)   matmul-operand dtype
    bc = bc_ref[...]                      # (C, 1)   f32
    nb = x_ref.shape[0]
    for b in range(nb):                   # static unroll over batches in block
        x = x_ref[b]                      # (C, HW_TILE)
        v = jnp.dot(wc, x, preferred_element_type=jnp.float32) + bc
        r = v * s_ref[b]                  # channel-wise CALayer rescale  (C,HW_TILE)
        out = x.astype(jnp.float32) + r * corr_ref[b].astype(jnp.float32)
        out_ref[b] = out.astype(out_ref.dtype)


# ---------------------------------------------------------------------------
# Wrapper: conv fold + per-image CALayer gate (tiny) + tiled pallas_call
# ---------------------------------------------------------------------------
def degra_block_pallas(x_flat, corr_flat, params, *,
                       io_dtype=jnp.float32, hw_tile_cap=8192):
    """x_flat, corr_flat: (N, C, HW) with HW on the lane axis.

    io_dtype: storage / matmul-operand dtype for x, corr, Wc.  Use bf16 on
    v6e/v7x to halve HBM traffic (the kernel is bandwidth bound); keep f32 on
    v5e and when validating against the f32 reference at tight tolerances.
    """
    N, C, HW = x_flat.shape
    w2, b2, w3, b3, wd1, wd2 = params
    hp = jax.lax.Precision.HIGHEST

    # conv fold:  conv3(conv2(x)) == Wc @ x + bc   (exact; both are 1x1, no act)
    wc = jnp.dot(w3, w2, precision=hp)                              # (C, C)
    bc = jnp.dot(w3, b2, precision=hp) + b3                         # (C, 1)

    # CALayer gate, once per image, outside the kernel:
    #   mean_HW(Wc@x + bc) == Wc @ mean_HW(x) + bc
    xbar = jnp.mean(x_flat.astype(jnp.float32), axis=2, keepdims=True)       # (N,C,1)
    vbar = jnp.einsum('oc,nci->noi', wc, xbar, precision=hp) + bc[None]
    tbar = jnp.maximum(jnp.einsum('rc,nci->nri', wd1, vbar, precision=hp), 0.0)
    s = jax.nn.sigmoid(jnp.einsum('cr,nri->nci', wd2, tbar, precision=hp))   # (N,C,1) f32

    # tiling: cap NB*HW_TILE at 8192 lanes -> ~0.9 MiB f32 block at C=28, so
    # x/corr/out double-buffered (~5.5 MiB) fit every generation's default
    # scoped VMEM (v5e 16 MiB, v7x 32 MiB) without raising vmem_limit_bytes.
    hw_tile = _pick_hw_tile(HW, hw_tile_cap)
    nb = _pick_batch_block(N, hw_tile, hw_tile_cap)
    grid = (N // nb, HW // hw_tile)

    x_io = x_flat.astype(io_dtype)
    corr_io = corr_flat.astype(io_dtype)
    wc_io = wc.astype(io_dtype)

    img_spec = pl.BlockSpec((nb, C, hw_tile), lambda b, t: (b, 0, t))
    gate_spec = pl.BlockSpec((nb, C, 1), lambda b, t: (b, 0, 0))
    full2d = lambda shp: pl.BlockSpec(shp, lambda b, t: (0, 0))

    itemsize = jnp.dtype(io_dtype).itemsize
    flops = 2 * N * C * C * HW + 4 * N * C * HW
    bytes_accessed = (3 * N * C * HW * itemsize          # x, corr read; out write
                      + C * C * itemsize + C * 4 + N * C * 4)

    # NOTE: no input_output_aliases — aliasing onto a non-donated jit argument
    # makes XLA insert a defensive copy of x (an extra hidden HBM pass).
    return pl.pallas_call(
        _degra_kernel,
        out_shape=jax.ShapeDtypeStruct((N, C, HW), io_dtype),
        grid_spec=pltpu.PrefetchScalarGridSpec(
            num_scalar_prefetch=0,
            grid=grid,
            in_specs=[
                img_spec,            # x
                img_spec,            # corr = func_A_inv(y - func_A(x))
                full2d((C, C)),      # folded conv weight  Wc = W3 @ W2
                full2d((C, 1)),      # folded conv bias    bc = W3 @ b2 + b3   (f32)
                gate_spec,           # per-image CALayer gate s               (f32)
            ],
            out_specs=img_spec,
        ),
        compiler_params=pltpu.CompilerParams(
            # no in-kernel reduction -> both grid axes are independent;
            # v7x's two TensorCores can shard either one.
            dimension_semantics=("parallel", "parallel")),
        cost_estimate=pl.CostEstimate(
            flops=flops, transcendentals=0, bytes_accessed=bytes_accessed),
    )(x_io, corr_io, wc_io, bc, s)


# ---------------------------------------------------------------------------
# NCHW wrapper taking user callables func_A / func_A_inv (plain-JAX glue)
# ---------------------------------------------------------------------------
def degra_block(x_nchw, y_nchw, func_A, func_A_inv, appendix, params,
                io_dtype=jnp.float32):
    yb = func_A(x_nchw, appendix)
    corr = func_A_inv(y_nchw - yb, appendix)      # user-supplied sensing operator

    N, C, H, W = x_nchw.shape
    # channel-first layout: NCHW -> (N, C, H*W) is a pure reshape (no HBM shuffle)
    out_flat = degra_block_pallas(x_nchw.reshape(N, C, H * W),
                                  corr.reshape(N, C, H * W), params,
                                  io_dtype=io_dtype)
    return out_flat.reshape(N, C, H, W).astype(x_nchw.dtype)


# ---------------------------------------------------------------------------
# Pure-JAX reference (unfused math, mirrors the PyTorch module)
# ---------------------------------------------------------------------------
def degra_block_ref(x_nchw, y_nchw, func_A, func_A_inv, appendix, params):
    w2, b2, w3, b3, wd1, wd2 = params
    yb = func_A(x_nchw, appendix)
    corr = func_A_inv(y_nchw - yb, appendix)

    N, C, H, W = x_nchw.shape
    x = x_nchw.reshape(N, C, H * W)
    c = corr.reshape(N, C, H * W)

    img = jnp.einsum('oc,ncs->nos', w2, x) + b2[None]
    v = jnp.einsum('oc,ncs->nos', w3, img) + b3[None]
    pooled = jnp.mean(v, axis=2, keepdims=True)
    t = jnp.maximum(jnp.einsum('rc,ncs->nrs', wd1, pooled), 0.0)
    s = jax.nn.sigmoid(jnp.einsum('cr,nrs->ncs', wd2, t))
    r = v * s
    out = x + r * c
    return out.reshape(N, C, H, W)


# ---------------------------------------------------------------------------
# Deterministic parameter init (shapes follow SAM(in_c) / CALayer(in_c, 8))
# Weights in PyTorch (out, in) layout; biases as (C, 1).
# ---------------------------------------------------------------------------
def init_params(key, in_c):
    cr = in_c // 8
    k = jax.random.split(key, 6)
    scale = 0.1
    w2 = scale * jax.random.normal(k[0], (in_c, in_c), jnp.float32)   # SAM.conv2
    b2 = scale * jax.random.normal(k[1], (in_c, 1), jnp.float32)
    w3 = scale * jax.random.normal(k[2], (in_c, in_c), jnp.float32)   # SAM.conv3
    b3 = scale * jax.random.normal(k[3], (in_c, 1), jnp.float32)
    wd1 = scale * jax.random.normal(k[4], (cr, in_c), jnp.float32)    # CALayer conv_du[0]
    wd2 = scale * jax.random.normal(k[5], (in_c, cr), jnp.float32)    # CALayer conv_du[2]
    return (w2, b2, w3, b3, wd1, wd2)
    # NOTE: SAM.conv1 (3x3) exists in __init__ but is unused in forward; omitted.


if __name__ == "__main__":
    N, C, H, W = 2, 28, 16, 16        # in_c=28 matches DegraBlock default; HW=256

    key = jax.random.PRNGKey(0)
    kx, ky, ka, kp = jax.random.split(key, 4)
    x_i = jax.random.normal(kx, (N, C, H, W), jnp.float32)
    y = jax.random.normal(ky, (N, C, H, W), jnp.float32)
    appendix = jax.random.uniform(ka, (N, C, H, W), jnp.float32)
    params = init_params(kp, C)

    # Example sensing operator pair (user-supplied callables in the original API).
    func_A = lambda v, app: v * app
    func_A_inv = lambda v, app: v * app

    run = jax.jit(lambda xi, yy, app, p: degra_block(xi, yy, func_A, func_A_inv, app, p))
    out = jax.block_until_ready(run(x_i, y, appendix, params))

    ref = degra_block_ref(x_i, y, func_A, func_A_inv, appendix, params)
    np.testing.assert_allclose(np.asarray(out), np.asarray(ref), rtol=1e-4, atol=1e-5)

    print("KERNEL_OK")
</pallas_src>

<mosaic_0001>
module attributes {stable_mosaic.version = 11 : i64} {
  func.func @_degra_kernel(%arg0: i32, %arg1: i32, %arg2: memref<2x28x256xf32, #tpu.memory_space<vmem>>, %arg3: memref<2x28x256xf32, #tpu.memory_space<vmem>>, %arg4: memref<28x28xf32, #tpu.memory_space<vmem>>, %arg5: memref<28x1xf32, #tpu.memory_space<vmem>>, %arg6: memref<2x28x1xf32, #tpu.memory_space<vmem>>, %arg7: memref<2x28x256xf32, #tpu.memory_space<vmem>>) attributes {dimension_semantics = [#tpu.dimension_semantics<parallel>, #tpu.dimension_semantics<parallel>], iteration_bounds = array<i64: 1, 1>, scalar_prefetch = 0 : i64, scratch_operands = 0 : i64, tpu.core_type = #tpu.core_type<tc>, window_params = [{transform_indices = @transform_0, window_bounds = array<i64: 2, 28, 256>}, {transform_indices = @transform_1, window_bounds = array<i64: 2, 28, 256>}, {pipeline_mode = #tpu.pipeline_mode<synchronous>, transform_indices = @transform_2, window_bounds = array<i64: 28, 28>}, {pipeline_mode = #tpu.pipeline_mode<synchronous>, transform_indices = @transform_3, window_bounds = array<i64: 28, 1>}, {transform_indices = @transform_4, window_bounds = array<i64: 2, 28, 1>}, {transform_indices = @transform_5, window_bounds = array<i64: 2, 28, 256>}]} {
    %c0 = arith.constant 0 : index
    %c0_0 = arith.constant 0 : index
    %0 = vector.load %arg4[%c0, %c0_0] : memref<28x28xf32, #tpu.memory_space<vmem>>, vector<28x28xf32>
    %c0_1 = arith.constant 0 : index
    %c0_2 = arith.constant 0 : index
    %1 = vector.load %arg5[%c0_1, %c0_2] : memref<28x1xf32, #tpu.memory_space<vmem>>, vector<28x1xf32>
    %c0_3 = arith.constant 0 : index
    %c0_4 = arith.constant 0 : index
    %c0_5 = arith.constant 0 : index
    %2 = vector.load %arg2[%c0_3, %c0_4, %c0_5] : memref<2x28x256xf32, #tpu.memory_space<vmem>>, vector<1x28x256xf32>
    %3 = vector.shape_cast %2 : vector<1x28x256xf32> to vector<28x256xf32>
    %cst = arith.constant dense<0.000000e+00> : vector<28x256xf32>
    %4 = tpu.matmul %0, %3, %cst {dimension_numbers = #tpu.dot_dimension_numbers<[1], [0], [0], [1], [0, 0, 1, 1], [], []>} : vector<28x28xf32>, vector<28x256xf32>, vector<28x256xf32> -> vector<28x256xf32>
    %5 = vector.broadcast %1 : vector<28x1xf32> to vector<28x256xf32>
    %6 = arith.addf %4, %5 : vector<28x256xf32>
    %c0_6 = arith.constant 0 : index
    %c0_7 = arith.constant 0 : index
    %c0_8 = arith.constant 0 : index
    %7 = vector.load %arg6[%c0_6, %c0_7, %c0_8] : memref<2x28x1xf32, #tpu.memory_space<vmem>>, vector<1x28x1xf32>
    %8 = vector.shape_cast %7 : vector<1x28x1xf32> to vector<28x1xf32>
    %9 = vector.broadcast %8 : vector<28x1xf32> to vector<28x256xf32>
    %10 = arith.mulf %6, %9 : vector<28x256xf32>
    %c0_9 = arith.constant 0 : index
    %c0_10 = arith.constant 0 : index
    %c0_11 = arith.constant 0 : index
    %11 = vector.load %arg3[%c0_9, %c0_10, %c0_11] : memref<2x28x256xf32, #tpu.memory_space<vmem>>, vector<1x28x256xf32>
    %12 = vector.shape_cast %11 : vector<1x28x256xf32> to vector<28x256xf32>
    %13 = arith.mulf %10, %12 : vector<28x256xf32>
    %14 = arith.addf %3, %13 : vector<28x256xf32>
    %c0_12 = arith.constant 0 : index
    %c0_13 = arith.constant 0 : index
    %c0_14 = arith.constant 0 : index
    %15 = vector.load %arg7[%c0_12, %c0_13, %c0_14] : memref<2x28x256xf32, #tpu.memory_space<vmem>>, vector<1x28x256xf32>
    %16 = vector.shape_cast %15 : vector<1x28x256xf32> to vector<28x256xf32>
    %17 = vector.shape_cast %14 : vector<28x256xf32> to vector<1x28x256xf32>
    tpu.vector_store %arg7[%c0_12, %c0_13, %c0_14], %17 {strides = array<i32>} : memref<2x28x256xf32, #tpu.memory_space<vmem>>, vector<1x28x256xf32>,
    %c1 = arith.constant 1 : index
    %c0_15 = arith.constant 0 : index
    %c0_16 = arith.constant 0 : index
    %18 = vector.load %arg2[%c1, %c0_15, %c0_16] : memref<2x28x256xf32, #tpu.memory_space<vmem>>, vector<1x28x256xf32>
    %19 = vector.shape_cast %18 : vector<1x28x256xf32> to vector<28x256xf32>
    %cst_17 = arith.constant dense<0.000000e+00> : vector<28x256xf32>
    %20 = tpu.matmul %0, %19, %cst_17 {dimension_numbers = #tpu.dot_dimension_numbers<[1], [0], [0], [1], [0, 0, 1, 1], [], []>} : vector<28x28xf32>, vector<28x256xf32>, vector<28x256xf32> -> vector<28x256xf32>
    %21 = vector.broadcast %1 : vector<28x1xf32> to vector<28x256xf32>
    %22 = arith.addf %20, %21 : vector<28x256xf32>
    %c1_18 = arith.constant 1 : index
    %c0_19 = arith.constant 0 : index
    %c0_20 = arith.constant 0 : index
    %23 = vector.load %arg6[%c1_18, %c0_19, %c0_20] : memref<2x28x1xf32, #tpu.memory_space<vmem>>, vector<1x28x1xf32>
    %24 = vector.shape_cast %23 : vector<1x28x1xf32> to vector<28x1xf32>
    %25 = vector.broadcast %24 : vector<28x1xf32> to vector<28x256xf32>
    %26 = arith.mulf %22, %25 : vector<28x256xf32>
    %c1_21 = arith.constant 1 : index
    %c0_22 = arith.constant 0 : index
    %c0_23 = arith.constant 0 : index
    %27 = vector.load %arg3[%c1_21, %c0_22, %c0_23] : memref<2x28x256xf32, #tpu.memory_space<vmem>>, vector<1x28x256xf32>
    %28 = vector.shape_cast %27 : vector<1x28x256xf32> to vector<28x256xf32>
    %29 = arith.mulf %26, %28 : vector<28x256xf32>
    %30 = arith.addf %19, %29 : vector<28x256xf32>
    %c1_24 = arith.constant 1 : index
    %c0_25 = arith.constant 0 : index
    %c0_26 = arith.constant 0 : index
    %31 = vector.load %arg7[%c1_24, %c0_25, %c0_26] : memref<2x28x256xf32, #tpu.memory_space<vmem>>, vector<1x28x256xf32>
    %32 = vector.shape_cast %31 : vector<1x28x256xf32> to vector<28x256xf32>
    %33 = vector.shape_cast %30 : vector<28x256xf32> to vector<1x28x256xf32>
    tpu.vector_store %arg7[%c1_24, %c0_25, %c0_26], %33 {strides = array<i32>} : memref<2x28x256xf32, #tpu.memory_space<vmem>>, vector<1x28x256xf32>,
    return
  }
  func.func @transform_0(%arg0: i32, %arg1: i32) -> (i32, i32, i32) {
    %c0_i32 = arith.constant 0 : i32
    %c0_i32_0 = arith.constant 0 : i32
    return %arg0, %c0_i32, %arg1 : i32, i32, i32
  }
  func.func @transform_1(%arg0: i32, %arg1: i32) -> (i32, i32, i32) {
    %c0_i32 = arith.constant 0 : i32
    %c0_i32_0 = arith.constant 0 : i32
    return %arg0, %c0_i32, %arg1 : i32, i32, i32
  }
  func.func @transform_2(%arg0: i32, %arg1: i32) -> (i32, i32) {
    %c0_i32 = arith.constant 0 : i32
    %c0_i32_0 = arith.constant 0 : i32
    %c0_i32_1 = arith.constant 0 : i32
    return %c0_i32, %c0_i32_0 : i32, i32
  }
  func.func @transform_3(%arg0: i32, %arg1: i32) -> (i32, i32) {
    %c0_i32 = arith.constant 0 : i32
    %c0_i32_0 = arith.constant 0 : i32
    %c0_i32_1 = arith.constant 0 : i32
    return %c0_i32, %c0_i32_0 : i32, i32
  }
  func.func @transform_4(%arg0: i32, %arg1: i32) -> (i32, i32, i32) {
    %c0_i32 = arith.constant 0 : i32
    %c0_i32_0 = arith.constant 0 : i32
    %c0_i32_1 = arith.constant 0 : i32
    return %arg0, %c0_i32, %c0_i32_0 : i32, i32, i32
  }
  func.func @transform_5(%arg0: i32, %arg1: i32) -> (i32, i32, i32) {
    %c0_i32 = arith.constant 0 : i32
    %c0_i32_0 = arith.constant 0 : i32
    return %arg0, %c0_i32, %arg1 : i32, i32, i32
  }
}

</mosaic_0001>

<bundles_post_ra>
// kernel: _lambda_.1
= control target key start
LH: loop header
LB: loop body
LE: loop exit
PB: predicated region body
PF: predicated region fallthrough
CT: control target
= control target key end

     0   :  { %vm69_vm0 = vcmask 1043456   ;;  %v469_v3 = vmov 0.0   ;;  %v470_v8 = vmov 0   ;;  %vm471_vm1 = vmmov 1   ;;  %s807_s0 = inlined_call_operand.vmem [shape: f32[2,28,256], index: 0, kind: input, shape index: {}]   ;;  %s808_s3 = inlined_call_operand.vmem [shape: f32[28,1], index: 3, kind: input, shape index: {}]   ;;  %s809_s2 = inlined_call_operand.vmem [shape: f32[28,28], index: 2, kind: input, shape index: {}]   ;;  %s810_s4 = inlined_call_operand.vmem [shape: f32[2,28,1], index: 4, kind: input, shape index: {}]   ;;  %s811_s1 = inlined_call_operand.vmem [shape: f32[2,28,256], index: 1, kind: input, shape index: {}]   ;;  %s812_s5 = inlined_call_operand.vmem [shape: f32[2,28,256], index: 5, kind: output, shape index: {}]  }
   0x1   :  { %v505_v0 = vld [vmem:[%s807_s0 + $0x8] sm:$0xff]  ;;  %v510_v1 = vld [vmem:[%s807_s0 + $0x18] sm:$0xff]  ;;  %140 = vmatprep.mubr.f32.mxu0 %v469_v3  ;;  %308 = vmatprep.mubr.f32.mxu1 %v469_v3  ;;  %v529_v6 = vld [vmem:[%s807_s0] sm:$0xff]  ;;  %vm56_vm3 = vcmask 228352  }
   0x2   :  { %v515_v2 = vld [vmem:[%s807_s0 + $0x48] sm:$0xff]  ;;  %v444_v4 = vpack.c.bf16 %v510_v1, %v505_v0  ;;  %v524_v5 = vld [vmem:[%s807_s0 + $0x58] sm:$0xff]  ;;  %v534_v7 = vld [vmem:[%s807_s0 + $0x10] sm:$0xff]  ;;  %468 = vset.pattern.permute.xlu1 %v470_v8  ;;  %467 = vset.pattern.permute.xlu0 %v470_v8 }
   0x3   :  { %v454_v9 = vpack.c.bf16 %v524_v5, %v515_v2  ;;  %v446_v10 = vpack.c.bf16 %v534_v7, %v529_v6  ;;  %v543_v11 = vld [vmem:[%s807_s0 + $0x40] sm:$0xff]  ;;  %v548_v12 = vld [vmem:[%s807_s0 + $0x50] sm:$0xff]  ;;  %v553_v13 = vld [vmem:[%s807_s0 + $0x28] sm:$0xff] }
   0x4   :  { %445 = vmatprep.subr.bf16.mxu0 %v444_v4  ;;  %v456_v14 = vpack.c.bf16 %v548_v12, %v543_v11  ;;  %v560_v15 = vld [vmem:[%s807_s0 + $0x38] sm:$0xf]  ;;  %vm563_vm2 = vmpackc.low %vm69_vm0, %vm471_vm1  ;;  %v570_v17 = vld [vmem:[%s807_s0 + $0x68] sm:$0xff] }
   0x5   :  { %455 = vmatprep.subr.bf16.mxu1 %v454_v9  ;;  %447 = vmatpush1.bf16.msra.mxu0 %v446_v10  ;;  %v448_v18 = vpack.c.bf16 %v560_v15, %v553_v13  ;;  %v577_v19 = vld [vmem:[%s807_s0 + $0x78] sm:$0xf]  ;;  %v582_v20 = vld [vmem:[%s807_s0 + $0x20] sm:$0xff]  ;;  %v587_v21 = vld [vmem:[%s807_s0 + $0x30] sm:$0xf] }
   0x6   :  { %457 = vmatpush1.bf16.msra.mxu1 %v456_v14  ;;  %v458_v22 = vpack.c.bf16 %v577_v19, %v570_v17  ;;  %v451_v23 = vpack.c.bf16 %v587_v21, %v582_v20  ;;  %v596_v24 = vld [vmem:[%s807_s0 + $0x60] sm:$0xff]  ;;  %v601_v25 = vld [vmem:[%s807_s0 + $0x70] sm:$0xf]  ;;  %v27_v30 = vld [vmem:[%s808_s3 + $0x18] sm:$0xf] }
   0x7   :  { %450 = vmatprep.subr.msk.bf16.mxu0 %vm563_vm2, %v448_v18  ;;  %v461_v26 = vpack.c.bf16 %v601_v25, %v596_v24  ;;  %v26_v27 = vld [vmem:[%s808_s3 + $0x10] sm:$0xff]  ;;  %v24_v28 = vld [vmem:[%s808_s3] sm:$0xff]  ;;  %v25_v31 = vld [vmem:[%s808_s3 + $0x8] sm:$0xff] }
   0x8   :  { %460 = vmatprep.subr.msk.bf16.mxu1 %vm563_vm2, %v458_v22  ;;  %v20_v29 = vld [vmem:[%s809_s2] sm:$0xff]  ;;  %48 = vperm.xlu1 %468, %v26_v27   ;;  %v21_v32 = vld [vmem:[%s809_s2 + $0x8] sm:$0xff]  ;;  %v22_v35 = vld [vmem:[%s809_s2 + $0x10] sm:$0xff] }
   0x9   :  { %453 = vmatpush1.bf16.msk.msra.mxu0 %vm563_vm2, %v451_v23  ;;  %38 = vperm.xlu0 %467, %v24_v28   ;;  %v166_v33 = vld [vmem:[%s810_s4 + $0x8] sm:$0xff]  ;;  %v165_v34 = vld [vmem:[%s810_s4] sm:$0xff]  ;;  %v168_v36 = vld [vmem:[%s810_s4 + $0x18] sm:$0xf] }
   0xa   :  { %463 = vmatpush1.bf16.msk.msra.mxu1 %vm563_vm2, %v461_v26  ;;  %v167_v37 = vld [vmem:[%s810_s4 + $0x10] sm:$0xff]  ;;  %v23_v38 = vld [vmem:[%s809_s2 + $0x18] sm:$0xf]  ;;  %v425_v39 = vld [vmem:[%s810_s4 + $0x28] sm:$0xff] }
   0xb   :  { %v424_v40 = vld [vmem:[%s810_s4 + $0x20] sm:$0xff]  ;;  %v427_v41 = vld [vmem:[%s810_s4 + $0x38] sm:$0xf]  ;;  %v426_v42 = vld [vmem:[%s810_s4 + $0x30] sm:$0xff] }
   0xc   :  { %406 = vmatmul.mubr.msk.f32.vlgmr.msra.gmra.mrb[0].mxu0 %vm56_vm3, %v20_v29  ;;  %53 = vperm.xlu1 %468, %v27_v30   ;;  %v197_v55 = vld [vmem:[%s811_s1] sm:$0xff]  ;;  %v198_v62 = vld [vmem:[%s811_s1 + $0x8] sm:$0xff]  ;;  %v199_v27 = vld [vmem:[%s811_s1 + $0x10] sm:$0xff] }
   0xd   :  { %420 = vmatmul.mubr.msk.f32.vlgmr.msra.gmra.mrb[0].mxu1 %vm56_vm3, %v20_v29  ;;  %146 = vmatprep.mubr.f32.mxu0 %v469_v3  ;;  %v428_v61 = vld [vmem:[%s811_s1 + $0x40] sm:$0xff]  ;;  %v429_v8 = vld [vmem:[%s811_s1 + $0x48] sm:$0xff] }
   0xe   :  { %314 = vmatprep.mubr.f32.mxu1 %v469_v3  ;;  %43 = vperm.xlu0 %467, %v25_v31  }
  0x10   :  { %407 = vmatmul.mubr.msk.f32.gmra.mrb[2].mxu0 %vm56_vm3, %v21_v32  ;;  %176 = vperm.xlu1 %468, %v166_v33  }
  0x11   :  { %421 = vmatmul.mubr.msk.f32.gmra.mrb[2].mxu1 %vm56_vm3, %v21_v32  ;;  %152 = vmatprep.mubr.f32.mxu0 %v469_v3 }
  0x12   :  { %320 = vmatprep.mubr.f32.mxu1 %v469_v3  ;;  %171 = vperm.xlu0 %467, %v165_v34  }
  0x14   :  { %408 = vmatmul.mubr.msk.f32.gmra.mrb[4].mxu0 %vm56_vm3, %v22_v35  ;;  %186 = vperm.xlu1 %468, %v168_v36   ;;  %v200_v36 = vld [vmem:[%s811_s1 + $0x18] sm:$0xff] }
  0x15   :  { %422 = vmatmul.mubr.msk.f32.gmra.mrb[4].mxu1 %vm56_vm3, %v22_v35  ;;  %158 = vmatprep.mubr.f32.mxu0 %v469_v3  ;;  %v430_v35 = vld [vmem:[%s811_s1 + $0x50] sm:$0xff] }
  0x16   :  { %326 = vmatprep.mubr.f32.mxu1 %v469_v3  ;;  %181 = vperm.xlu0 %467, %v167_v37  }
  0x18   :  { %409 = vmatmul.mubr.msk.f32.gmra.mrb[6].mxu0 %vm56_vm3, %v23_v38  ;;  %345 = vperm.xlu1 %468, %v425_v39  }
  0x19   :  { %423 = vmatmul.mubr.msk.f32.gmra.mrb[6].mxu1 %vm56_vm3, %v23_v38 }
  0x1a   :  { %340 = vperm.xlu0 %467, %v424_v40  }
  0x1c   :  { %355 = vperm.xlu1 %468, %v427_v41  }
  0x1e   :  { %350 = vperm.xlu0 %467, %v426_v42  }
  0x87   :  { %v675_v44 = vpop.permute.xlu1 %48 }
  0x88   :  { %v39_v43 = vpop.permute.xlu0 %38 }
  0x8b   :  { %v677_v46 = vpop.permute.xlu1 %53 }
  0x8d   :  { %v44_v45 = vpop.permute.xlu0 %43 }
  0x8f   :  { %v177_v48 = vpop.permute.xlu1 %176 }
  0x91   :  { %v172_v47 = vpop.permute.xlu0 %171 }
  0x93   :  { %v681_v50 = vpop.permute.xlu1 %186 }
  0x95   :  { %v679_v49 = vpop.permute.xlu0 %181 }
  0x97   :  { %v346_v31 = vpop.permute.xlu1 %345 }
  0x99   :  { %v341_v59 = vpop.permute.xlu0 %340 }
  0xdf   :  { %v142_v51 = vpop.f32.mrb[0].mxu0 }
  0xe0   :  { %v143_v52 = vadd.f32 %v142_v51, %v39_v43  ;;  %v310_v53 = vpop.f32.mrb[0].mxu1  ;;  %v144_v54 = vpop.f32.mrb[1].mxu0 }
  0xe1   :  { %v311_v56 = vadd.f32 %v310_v53, %v39_v43  ;;  %v145_v57 = vadd.f32 %v144_v54, %v39_v43  ;;  %v312_v58 = vpop.f32.mrb[1].mxu1 }
  0xe2   :  { %v189_v60 = vmul.f32 %v172_v47, %v143_v52  ;;  %v313_v63 = vadd.f32 %v312_v58, %v39_v43 }
  0xe3   :  { %v358_v3 = vmul.f32 %v341_v59, %v311_v56  ;;  %v190_v4 = vmul.f32 %v172_v47, %v145_v57  ;;  %v148_v9 = vpop.f32.mrb[2].mxu0  ;;  %v351_v56 = vpop.permute.xlu0 %350 }
  0xe4   :  { %v205_v10 = vmul.f32 %v197_v55, %v189_v60  ;;  %v359_v14 = vmul.f32 %v341_v59, %v313_v63  ;;  %v149_v16 = vadd.f32 %v148_v9, %v44_v45  ;;  %v316_v18 = vpop.f32.mrb[2].mxu1  ;;  %v150_v22 = vpop.f32.mrb[3].mxu0  ;;  %v432_v60 = vld [vmem:[%s811_s1 + $0x60] sm:$0xff] }
  0xe5   :  { %v375_v23 = vmul.f32 %v428_v61, %v358_v3  ;;  %v206_v26 = vmul.f32 %v198_v62, %v190_v4  ;;  %v317_v28 = vadd.f32 %v316_v18, %v44_v45  ;;  %v151_v29 = vadd.f32 %v150_v22, %v44_v45  ;;  %v318_v30 = vpop.f32.mrb[3].mxu1  ;;  %v202_v61 = vld [vmem:[%s811_s1 + $0x28] sm:$0xff] }
  0xe6   :  { %v213_v32 = vadd.f32 %v205_v10, %v529_v6  ;;  %v376_v33 = vmul.f32 %v429_v8, %v359_v14  ;;  %v191_v34 = vmul.f32 %v177_v48, %v149_v16  ;;  %v319_v37 = vadd.f32 %v318_v30, %v44_v45  ;;  %v431_v6 = vld [vmem:[%s811_s1 + $0x58] sm:$0xff]  ;;  %v433_v8 = vld [vmem:[%s811_s1 + $0x68] sm:$0xff] }
  0xe7   :  { %v383_v38 = vadd.f32 %v543_v11, %v375_v23  ;;  %v214_v39 = vadd.f32 %v206_v26, %v505_v0  ;;  %v360_v40 = vmul.f32 %v346_v31, %v317_v28  ;;  %v192_v41 = vmul.f32 %v177_v48, %v151_v29  ;;  %v154_v42 = vpop.f32.mrb[4].mxu0 }
  0xe8   :  { %221 = vst [vmem:[%s812_s5] sm:$0xff] %v213_v32  ;;  %v384_v43 = vadd.f32 %v515_v2, %v376_v33  ;;  %v207_v47 = vmul.f32 %v199_v27, %v191_v34  ;;  %v361_v51 = vmul.f32 %v346_v31, %v319_v37  ;;  %v155_v45 = vadd.f32 %v154_v42, %v675_v44  ;;  %v322_v11 = vpop.f32.mrb[4].mxu1  ;;  %v156_v52 = vpop.f32.mrb[5].mxu0  ;;  %v201_v2 = vld [vmem:[%s811_s1 + $0x20] sm:$0xff]  ;;  %v434_v31 = vld [vmem:[%s811_s1 + $0x70] sm:$0xf] }
  0xe9   :  { %436 = vst [vmem:[%s812_s5 + $0x40] sm:$0xff] %v383_v38  ;;  %222 = vst [vmem:[%s812_s5 + $0x8] sm:$0xff] %v214_v39  ;;  %v377_v0 = vmul.f32 %v430_v35, %v360_v40  ;;  %v208_v48 = vmul.f32 %v200_v36, %v192_v41  ;;  %v323_v53 = vadd.f32 %v322_v11, %v675_v44  ;;  %v324_v55 = vpop.f32.mrb[5].mxu1  ;;  %v356_v27 = vpop.permute.xlu1 %355  ;;  %v204_v32 = vld [vmem:[%s811_s1 + $0x38] sm:$0xf] }
  0xea   :  { %v157_v54 = vadd.f32 %v156_v52, %v675_v44  ;;  %437 = vst [vmem:[%s812_s5 + $0x48] sm:$0xff] %v384_v43  ;;  %v215_v57 = vadd.f32 %v207_v47, %v534_v7  ;;  %v378_v58 = vmul.f32 %v431_v6, %v361_v51  ;;  %v193_v59 = vmul.f32 %v679_v49, %v155_v45  ;;  %v435_v37 = vld [vmem:[%s811_s1 + $0x78] sm:$0xf] }
  0xeb   :  { %v325_v62 = vadd.f32 %v324_v55, %v675_v44  ;;  %v385_v63 = vadd.f32 %v548_v12, %v377_v0  ;;  %v216_v3 = vadd.f32 %v208_v48, %v510_v1  ;;  %v362_v4 = vmul.f32 %v351_v56, %v323_v53  ;;  %v160_v9 = vpop.f32.mrb[6].mxu0 }
  0xec   :  { %v194_v7 = vmul.f32 %v679_v49, %v157_v54  ;;  %223 = vst [vmem:[%s812_s5 + $0x10] sm:$0xff] %v215_v57  ;;  %v386_v10 = vadd.f32 %v524_v5, %v378_v58  ;;  %v209_v14 = vmul.f32 %v201_v2, %v193_v59  ;;  %v161_v12 = vadd.f32 %v160_v9, %v677_v46  ;;  %v328_v16 = vpop.f32.mrb[6].mxu1  ;;  %v162_v1 = vpop.f32.mrb[7].mxu0  ;;  %v203_v5 = vld [vmem:[%s811_s1 + $0x30] sm:$0xf] }
  0xed   :  { %v363_v44 = vmul.f32 %v351_v56, %v325_v62  ;;  %438 = vst [vmem:[%s812_s5 + $0x50] sm:$0xff] %v385_v63  ;;  %224 = vst [vmem:[%s812_s5 + $0x18] sm:$0xff] %v216_v3  ;;  %v379_v49 = vmul.f32 %v432_v60, %v362_v4  ;;  %v329_v22 = vadd.f32 %v328_v16, %v677_v46  ;;  %v330_v26 = vpop.f32.mrb[7].mxu1 }
  0xee   :  { %v210_v18 = vmul.f32 %v202_v61, %v194_v7  ;;  %v163_v23 = vadd.f32 %v162_v1, %v677_v46  ;;  %439 = vst [vmem:[%s812_s5 + $0x58] sm:$0xff] %v386_v10  ;;  %v217_v28 = vadd.f32 %v209_v14, %v582_v20  ;;  %v195_v30 = vmul.f32 %v681_v50, %v161_v12 }
  0xef   :  { %v380_v29 = vmul.f32 %v433_v8, %v363_v44  ;;  %v331_v33 = vadd.f32 %v330_v26, %v677_v46  ;;  %v387_v34 = vadd.f32 %v596_v24, %v379_v49  ;;  %v364_v36 = vmul.f32 %v356_v27, %v329_v22 }
  0xf0   :  { %v218_v35 = vadd.f32 %v210_v18, %v553_v13  ;;  %v196_v20 = vmul.f32 %v681_v50, %v163_v23  ;;  %225 = vst [vmem:[%s812_s5 + $0x20] sm:$0xff] %v217_v28  ;;  %v211_v39 = vmul.f32 %v203_v5, %v195_v30 }
  0xf1   :  { %v388_v38 = vadd.f32 %v570_v17, %v380_v29  ;;  %v365_v40 = vmul.f32 %v356_v27, %v331_v33  ;;  %440 = vst [vmem:[%s812_s5 + $0x60] sm:$0xff] %v387_v34  ;;  %v381_v13 = vmul.f32 %v434_v31, %v364_v36 }
  0xf2   :  { %226 = vst [vmem:[%s812_s5 + $0x28] sm:$0xff] %v218_v35  ;;  %v212_v24 = vmul.f32 %v204_v32, %v196_v20  ;;  %v219_v46 = vadd.f32 %v211_v39, %v587_v21 }
  0xf3   :  { %441 = vst [vmem:[%s812_s5 + $0x68] sm:$0xff] %v388_v38  ;;  %v382_v50 = vmul.f32 %v435_v37, %v365_v40  ;;  %v389_v17 = vadd.f32 %v601_v25, %v381_v13 }
  0xf4   :  { %v220_v41 = vadd.f32 %v212_v24, %v560_v15  ;;  %227 = vst [vmem:[%s812_s5 + $0x30] sm:$0xf] %v219_v46 }
  0xf5   :  { %v390_v6 = vadd.f32 %v577_v19, %v382_v50  ;;  %442 = vst [vmem:[%s812_s5 + $0x70] sm:$0xf] %v389_v17 }
  0xf6   :  { %228 = vst [vmem:[%s812_s5 + $0x38] sm:$0xf] %v220_v41 }
  0xf7   :  { %443 = vst [vmem:[%s812_s5 + $0x78] sm:$0xf] %v390_v6 }

</bundles_post_ra>
